<compile_context>
chip_gen: v7x
topology: tpu7x:2x2x1
jax: 0.10.0
libtpu: 0.0.40
codegen_flags: <defaults>
</compile_context>

<pallas_src>
import jax
import jax.numpy as jnp
from jax import lax
from jax.experimental import pallas as pl
from jax.experimental.pallas import tpu as pltpu

INF = 1e20
_LANE = 128
_SUBLANE = 8


def _round_up(x, m):
    return (x + m - 1) // m * m


def _pad_to(x, shape):
    pads = [(0, s - d) for d, s in zip(x.shape, shape)]
    if all(p == (0, 0) for p in pads):
        return x
    return jnp.pad(x, pads)


def _make_kernel(share_ctx):
    def kernel(ctx_ref, q_ref, oq_ref, bias_ref, w_ref, out_ref, ctx_fc_ref):
        # ctx_ref   : (1, 1 or TT, Cp, Dp)  bf16
        # q_ref     : (1, TT, Qp, Dp)       bf16
        # oq_ref    : (1, TT, Qp, Op)       bf16
        # bias_ref  : (1, TT, 1, Qp)        f32 additive mask bias (0 / -INF)
        # w_ref     : (Dp, Hp)              bf16 shared linear weight (x @ W)
        # out_ref   : (1, TT, Cp, Op)       f32
        # ctx_fc_ref: (Cp, Hp)              bf16 VMEM scratch (shared-ctx path)
        tt = q_ref.shape[1]
        w = w_ref[...]

        def fc(x):  # relu(x @ W): bf16 operands, f32 accumulate, bf16 result
            y = jnp.dot(x, w, preferred_element_type=jnp.float32)
            return jnp.maximum(y, 0.0).astype(jnp.bfloat16)

        if share_ctx:
            # Context identical for every turn: compute relu(ctx @ W) once per
            # batch (turn-block 0) and reuse the cached VMEM copy afterwards.
            @pl.when(pl.program_id(1) == 0)
            def _():
                ctx_fc_ref[...] = fc(ctx_ref[0, 0])

            ctx_fc_shared = ctx_fc_ref[...]

        for t in range(tt):  # TT is small & static -> unrolled at trace time
            ctx_fc = ctx_fc_shared if share_ctx else fc(ctx_ref[0, t])
            q_fc = fc(q_ref[0, t])                              # (Qp, Hp)

            # Transpose-free contraction over hidden: (Cp,Hp)x(Qp,Hp)->(Cp,Qp)
            att = lax.dot_general(ctx_fc, q_fc, (((1,), (1,)), ((), ())),
                                  preferred_element_type=jnp.float32)
            att = att + bias_ref[0, t]                          # (1,Qp) bcast

            m = jnp.max(att, axis=-1, keepdims=True)
            e = jnp.exp(att - m)
            denom = jnp.sum(e, axis=-1, keepdims=True)
            prob = e * (1.0 / denom)                            # exact recip

            out_ref[0, t] = jnp.dot(
                prob.astype(jnp.bfloat16), oq_ref[0, t],
                preferred_element_type=jnp.float32).astype(out_ref.dtype)

    return kernel


def context2question_attention(context, questions, out_questions, weight,
                               ques_mask=None, *, turns_per_step=8):
    """
    context       : (B, Tc, ctx_size, dim)   Tc == 1 (broadcast) or Tc == T
    questions     : (B, T, ques_size, dim)
    out_questions : (B, T, ques_size, out_dim)
    weight        : (dim, hidden)            == nn.Linear(dim, hidden).weight.T
    ques_mask     : (B, T, ques_size) or None
    returns       : (B, T, ctx_size, out_dim) float32
    """
    B, T, Q, D = questions.shape
    Tc, C = context.shape[1], context.shape[2]
    O = out_questions.shape[-1]
    H = weight.shape[1]
    assert context.shape == (B, Tc, C, D)
    assert out_questions.shape == (B, T, Q, O)
    assert Tc in (1, T), "context turn axis must be 1 (broadcast) or == T"
    share_ctx = Tc == 1

    f32, bf16 = jnp.float32, jnp.bfloat16
    Dp = _round_up(D, _LANE)
    Hp = _round_up(H, _LANE)
    Op = _round_up(O, _LANE)
    Qp = _round_up(Q, _SUBLANE)
    Cp = _round_up(C, _SUBLANE)
    TT = max(1, min(T, turns_per_step))
    Tp = _round_up(T, TT)
    NT = Tp // TT

    ctx_p = _pad_to(context.astype(bf16), (B, 1 if share_ctx else Tp, Cp, Dp))
    q_p = _pad_to(questions.astype(bf16), (B, Tp, Qp, Dp))
    oq_p = _pad_to(out_questions.astype(bf16), (B, Tp, Qp, Op))
    w_p = _pad_to(weight.astype(bf16), (Dp, Hp))

    if ques_mask is None:
        mask = jnp.ones((B, T, Q), dtype=f32)
    else:
        mask = ques_mask.astype(f32)
    # Zero padding along the turn/question axes becomes a -INF bias, so padded
    # positions never contribute to the softmax or the output.
    mask_p = _pad_to(mask, (B, Tp, Qp))
    bias = ((mask_p - 1.0) * INF).reshape(B, Tp, 1, Qp)

    ctx_tb = 1 if share_ctx else TT
    ctx_index = ((lambda b, t: (b, 0, 0, 0)) if share_ctx
                 else (lambda b, t: (b, t, 0, 0)))

    grid_spec = pltpu.PrefetchScalarGridSpec(
        num_scalar_prefetch=0,
        grid=(B, NT),
        in_specs=[
            pl.BlockSpec((1, ctx_tb, Cp, Dp), ctx_index),
            pl.BlockSpec((1, TT, Qp, Dp), lambda b, t: (b, t, 0, 0)),
            pl.BlockSpec((1, TT, Qp, Op), lambda b, t: (b, t, 0, 0)),
            pl.BlockSpec((1, TT, 1, Qp), lambda b, t: (b, t, 0, 0)),
            pl.BlockSpec((Dp, Hp), lambda b, t: (0, 0)),
        ],
        out_specs=pl.BlockSpec((1, TT, Cp, Op), lambda b, t: (b, t, 0, 0)),
        scratch_shapes=[pltpu.VMEM((Cp, Hp), bf16)],
    )

    # VMEM budget: double-buffered in/out blocks + weight + ctx_fc scratch,
    # clamped so the same tiling stays legal on v7x (64 MiB physical VMEM).
    blk_bytes = (2 * (ctx_tb * Cp * Dp + TT * Qp * Dp + TT * Qp * Op)
                 + 4 * TT * Qp + 4 * TT * Cp * Op)
    est = 2 * blk_bytes + 2 * 2 * Dp * Hp + 2 * Cp * Hp + (2 << 20)
    vmem_limit = int(min(max(est, 16 << 20), 48 << 20))

    out_p = pl.pallas_call(
        _make_kernel(share_ctx),
        out_shape=jax.ShapeDtypeStruct((B, Tp, Cp, Op), f32),
        grid_spec=grid_spec,
        compiler_params=pltpu.CompilerParams(
            dimension_semantics=("parallel", "arbitrary"),
            vmem_limit_bytes=vmem_limit,
        ),
    )(ctx_p, q_p, oq_p, bias, w_p)

    return out_p[:, :T, :C, :O]


def _reference(context, questions, out_questions, weight, ques_mask):
    # Pure-JAX mirror of the PyTorch forward, using the same bf16-operand /
    # f32-accumulate matmul convention the kernel uses on the MXU.
    B, T = questions.shape[:2]
    bf16, f32 = jnp.bfloat16, jnp.float32
    cb = context.astype(bf16)
    qb = questions.astype(bf16)
    ob = out_questions.astype(bf16)
    wb = weight.astype(bf16)

    ctx_fc = jax.nn.relu(jnp.einsum("btcd,dh->btch", cb, wb,
                                    preferred_element_type=f32)).astype(bf16)
    if ctx_fc.shape[1] == 1:
        ctx_fc = jnp.broadcast_to(ctx_fc, (B, T) + ctx_fc.shape[2:])
    q_fc = jax.nn.relu(jnp.einsum("btqd,dh->btqh", qb, wb,
                                  preferred_element_type=f32)).astype(bf16)
    att = jnp.einsum("btch,btqh->btcq", ctx_fc, q_fc,
                     preferred_element_type=f32)
    if ques_mask is not None:
        keep = ques_mask.astype(bool)[:, :, None, :]        # (B, T, 1, Q)
        att = jnp.where(keep, att, -INF)
    m = jnp.max(att, axis=-1, keepdims=True)
    e = jnp.exp(att - m)
    prob = e * (1.0 / jnp.sum(e, axis=-1, keepdims=True))
    return jnp.einsum("btcq,btqo->btco", prob.astype(bf16), ob,
                      preferred_element_type=f32)


def _check(context, questions, out_questions, weight, ques_mask):
    out = context2question_attention(context, questions, out_questions,
                                     weight, ques_mask)
    out = jax.block_until_ready(out)
    ref = _reference(context, questions, out_questions, weight, ques_mask)
    assert out.shape == ref.shape
    err = float(jnp.max(jnp.abs(out - ref)))
    assert jnp.allclose(out, ref, atol=2e-3, rtol=2e-3), err
    return err


if __name__ == "__main__":
    key = jax.random.PRNGKey(0)
    B, T, ctx_size, ques_size = 2, 3, 16, 8
    dim, hidden, out_dim = 32, 32, 32

    k1, k2, k3, k4, k5, k6 = jax.random.split(key, 6)
    questions = jax.random.normal(k2, (B, T, ques_size, dim),
                                  dtype=jnp.float32)
    out_questions = jax.random.normal(k3, (B, T, ques_size, out_dim),
                                      dtype=jnp.float32)
    # deterministic linear_sim weight (nn.Linear(dim, hidden, bias=False));
    # stored as (dim, hidden) == weight.T so the kernel computes x @ W.
    weight = (jax.random.normal(k4, (dim, hidden), dtype=jnp.float32)
              * (1.0 / jnp.sqrt(dim)))
    # binary question mask with some padding zeros
    ques_mask = (jax.random.uniform(k5, (B, T, ques_size)) > 0.25).astype(
        jnp.float32)

    # Case 1: context shared across turns (Tc == 1), with a question mask.
    context1 = jax.random.normal(k1, (B, 1, ctx_size, dim), dtype=jnp.float32)
    _check(context1, questions, out_questions, weight, ques_mask)

    # Case 2: per-turn context (Tc == T), no mask.
    context2 = jax.random.normal(k6, (B, T, ctx_size, dim), dtype=jnp.float32)
    _check(context2, questions, out_questions, weight, None)

    print("KERNEL_OK")
</pallas_src>

<mosaic_0001>
module attributes {stable_mosaic.version = 11 : i64} {
  func.func @kernel(%arg0: i32, %arg1: i32, %arg2: memref<1x1x16x128xbf16, #tpu.memory_space<vmem>>, %arg3: memref<1x3x8x128xbf16, #tpu.memory_space<vmem>>, %arg4: memref<1x3x8x128xbf16, #tpu.memory_space<vmem>>, %arg5: memref<1x3x1x8xf32, #tpu.memory_space<vmem>>, %arg6: memref<128x128xbf16, #tpu.memory_space<vmem>>, %arg7: memref<1x3x16x128xf32, #tpu.memory_space<vmem>>, %arg8: memref<16x128xbf16, #tpu.memory_space<vmem>>) attributes {dimension_semantics = [#tpu.dimension_semantics<parallel>, #tpu.dimension_semantics<arbitrary>], iteration_bounds = array<i64: 2, 1>, scalar_prefetch = 0 : i64, scratch_operands = 1 : i64, tpu.core_type = #tpu.core_type<tc>, window_params = [{transform_indices = @transform_0, window_bounds = array<i64: 1, 1, 16, 128>}, {transform_indices = @transform_1, window_bounds = array<i64: 1, 3, 8, 128>}, {transform_indices = @transform_2, window_bounds = array<i64: 1, 3, 8, 128>}, {transform_indices = @transform_3, window_bounds = array<i64: 1, 3, 1, 8>}, {pipeline_mode = #tpu.pipeline_mode<synchronous>, transform_indices = @transform_4, window_bounds = array<i64: 128, 128>}, {transform_indices = @transform_5, window_bounds = array<i64: 1, 3, 16, 128>}]} {
    %c0 = arith.constant 0 : index
    %c0_0 = arith.constant 0 : index
    %0 = vector.load %arg6[%c0, %c0_0] : memref<128x128xbf16, #tpu.memory_space<vmem>>, vector<128x128xbf16>
    %c0_i32 = arith.constant 0 : i32
    %1 = arith.cmpi eq, %arg1, %c0_i32 : i32
    %2 = arith.extui %1 : i1 to i32
    %c0_i32_1 = arith.constant 0 : i32
    %3 = arith.cmpi ne, %2, %c0_i32_1 : i32
    scf.if %3 {
      %c0_70 = arith.constant 0 : index
      %c0_71 = arith.constant 0 : index
      %c0_72 = arith.constant 0 : index
      %c0_73 = arith.constant 0 : index
      %92 = vector.load %arg2[%c0_70, %c0_71, %c0_72, %c0_73] : memref<1x1x16x128xbf16, #tpu.memory_space<vmem>>, vector<1x1x16x128xbf16>
      %93 = vector.shape_cast %92 : vector<1x1x16x128xbf16> to vector<16x128xbf16>
      %cst_74 = arith.constant dense<0.000000e+00> : vector<16x128xf32>
      %94 = tpu.matmul %93, %0, %cst_74 {dimension_numbers = #tpu.dot_dimension_numbers<[1], [0], [0], [1], [0, 0, 1, 1], [], []>} : vector<16x128xbf16>, vector<128x128xbf16>, vector<16x128xf32> -> vector<16x128xf32>
      %cst_75 = arith.constant 0.000000e+00 : f32
      %95 = vector.broadcast %cst_75 : f32 to vector<16x128xf32>
      %96 = arith.maximumf %94, %95 : vector<16x128xf32>
      %97 = arith.truncf %96 : vector<16x128xf32> to vector<16x128xbf16>
      %c0_76 = arith.constant 0 : index
      %c0_77 = arith.constant 0 : index
      %98 = vector.load %arg8[%c0_76, %c0_77] : memref<16x128xbf16, #tpu.memory_space<vmem>>, vector<16x128xbf16>
      tpu.vector_store %arg8[%c0_76, %c0_77], %97 {strides = array<i32>} : memref<16x128xbf16, #tpu.memory_space<vmem>>, vector<16x128xbf16>,
    } else {
    }
    %c0_2 = arith.constant 0 : index
    %c0_3 = arith.constant 0 : index
    %4 = vector.load %arg8[%c0_2, %c0_3] : memref<16x128xbf16, #tpu.memory_space<vmem>>, vector<16x128xbf16>
    %c0_4 = arith.constant 0 : index
    %c0_5 = arith.constant 0 : index
    %c0_6 = arith.constant 0 : index
    %c0_7 = arith.constant 0 : index
    %5 = vector.load %arg3[%c0_4, %c0_5, %c0_6, %c0_7] : memref<1x3x8x128xbf16, #tpu.memory_space<vmem>>, vector<1x1x8x128xbf16>
    %6 = vector.shape_cast %5 : vector<1x1x8x128xbf16> to vector<8x128xbf16>
    %cst = arith.constant dense<0.000000e+00> : vector<8x128xf32>
    %7 = tpu.matmul %6, %0, %cst {dimension_numbers = #tpu.dot_dimension_numbers<[1], [0], [0], [1], [0, 0, 1, 1], [], []>} : vector<8x128xbf16>, vector<128x128xbf16>, vector<8x128xf32> -> vector<8x128xf32>
    %cst_8 = arith.constant 0.000000e+00 : f32
    %8 = vector.broadcast %cst_8 : f32 to vector<8x128xf32>
    %9 = arith.maximumf %7, %8 : vector<8x128xf32>
    %10 = arith.truncf %9 : vector<8x128xf32> to vector<8x128xbf16>
    %cst_9 = arith.constant dense<0.000000e+00> : vector<16x8xf32>
    %11 = tpu.matmul %4, %10, %cst_9 {dimension_numbers = #tpu.dot_dimension_numbers<[1], [1], [0], [0], [0, 0, 1, 0], [], []>} : vector<16x128xbf16>, vector<8x128xbf16>, vector<16x8xf32> -> vector<16x8xf32>
    %c0_10 = arith.constant 0 : index
    %c0_11 = arith.constant 0 : index
    %c0_12 = arith.constant 0 : index
    %c0_13 = arith.constant 0 : index
    %12 = vector.load %arg5[%c0_10, %c0_11, %c0_12, %c0_13] : memref<1x3x1x8xf32, #tpu.memory_space<vmem>>, vector<1x1x1x8xf32>
    %13 = vector.shape_cast %12 : vector<1x1x1x8xf32> to vector<1x8xf32>
    %14 = vector.broadcast %13 : vector<1x8xf32> to vector<16x8xf32>
    %15 = arith.addf %11, %14 : vector<16x8xf32>
    %cst_14 = arith.constant dense<0xFF800000> : vector<16xf32>
    %16 = vector.multi_reduction <maximumf>, %15, %cst_14 [1] : vector<16x8xf32> to vector<16xf32>
    %17 = vector.shape_cast %16 : vector<16xf32> to vector<16x1xf32>
    %18 = vector.broadcast %17 : vector<16x1xf32> to vector<16x8xf32>
    %19 = arith.subf %15, %18 : vector<16x8xf32>
    %20 = math.exp %19 : vector<16x8xf32>
    %cst_15 = arith.constant dense<0.000000e+00> : vector<16xf32>
    %21 = vector.multi_reduction <add>, %20, %cst_15 [1] : vector<16x8xf32> to vector<16xf32>
    %22 = vector.shape_cast %21 : vector<16xf32> to vector<16x1xf32>
    %cst_16 = arith.constant 1.000000e+00 : f32
    %23 = vector.broadcast %cst_16 : f32 to vector<16x1xf32>
    %24 = arith.divf %23, %22 : vector<16x1xf32>
    %25 = vector.broadcast %24 : vector<16x1xf32> to vector<16x8xf32>
    %26 = arith.mulf %20, %25 : vector<16x8xf32>
    %27 = arith.truncf %26 : vector<16x8xf32> to vector<16x8xbf16>
    %c0_17 = arith.constant 0 : index
    %c0_18 = arith.constant 0 : index
    %c0_19 = arith.constant 0 : index
    %c0_20 = arith.constant 0 : index
    %28 = vector.load %arg4[%c0_17, %c0_18, %c0_19, %c0_20] : memref<1x3x8x128xbf16, #tpu.memory_space<vmem>>, vector<1x1x8x128xbf16>
    %29 = vector.shape_cast %28 : vector<1x1x8x128xbf16> to vector<8x128xbf16>
    %cst_21 = arith.constant dense<0.000000e+00> : vector<16x128xf32>
    %30 = tpu.matmul %27, %29, %cst_21 {dimension_numbers = #tpu.dot_dimension_numbers<[1], [0], [0], [1], [0, 0, 1, 1], [], []>} : vector<16x8xbf16>, vector<8x128xbf16>, vector<16x128xf32> -> vector<16x128xf32>
    %c0_22 = arith.constant 0 : index
    %c0_23 = arith.constant 0 : index
    %c0_24 = arith.constant 0 : index
    %c0_25 = arith.constant 0 : index
    %31 = vector.load %arg7[%c0_22, %c0_23, %c0_24, %c0_25] : memref<1x3x16x128xf32, #tpu.memory_space<vmem>>, vector<1x1x16x128xf32>
    %32 = vector.shape_cast %31 : vector<1x1x16x128xf32> to vector<16x128xf32>
    %33 = vector.shape_cast %30 : vector<16x128xf32> to vector<1x1x16x128xf32>
    tpu.vector_store %arg7[%c0_22, %c0_23, %c0_24, %c0_25], %33 {strides = array<i32>} : memref<1x3x16x128xf32, #tpu.memory_space<vmem>>, vector<1x1x16x128xf32>,
    %c0_26 = arith.constant 0 : index
    %c1 = arith.constant 1 : index
    %c0_27 = arith.constant 0 : index
    %c0_28 = arith.constant 0 : index
    %34 = vector.load %arg3[%c0_26, %c1, %c0_27, %c0_28] : memref<1x3x8x128xbf16, #tpu.memory_space<vmem>>, vector<1x1x8x128xbf16>
    %35 = vector.shape_cast %34 : vector<1x1x8x128xbf16> to vector<8x128xbf16>
    %cst_29 = arith.constant dense<0.000000e+00> : vector<8x128xf32>
    %36 = tpu.matmul %35, %0, %cst_29 {dimension_numbers = #tpu.dot_dimension_numbers<[1], [0], [0], [1], [0, 0, 1, 1], [], []>} : vector<8x128xbf16>, vector<128x128xbf16>, vector<8x128xf32> -> vector<8x128xf32>
    %cst_30 = arith.constant 0.000000e+00 : f32
    %37 = vector.broadcast %cst_30 : f32 to vector<8x128xf32>
    %38 = arith.maximumf %36, %37 : vector<8x128xf32>
    %39 = arith.truncf %38 : vector<8x128xf32> to vector<8x128xbf16>
    %cst_31 = arith.constant dense<0.000000e+00> : vector<16x8xf32>
    %40 = tpu.matmul %4, %39, %cst_31 {dimension_numbers = #tpu.dot_dimension_numbers<[1], [1], [0], [0], [0, 0, 1, 0], [], []>} : vector<16x128xbf16>, vector<8x128xbf16>, vector<16x8xf32> -> vector<16x8xf32>
    %c0_32 = arith.constant 0 : index
    %c1_33 = arith.constant 1 : index
    %c0_34 = arith.constant 0 : index
    %c0_35 = arith.constant 0 : index
    %41 = vector.load %arg5[%c0_32, %c1_33, %c0_34, %c0_35] : memref<1x3x1x8xf32, #tpu.memory_space<vmem>>, vector<1x1x1x8xf32>
    %42 = vector.shape_cast %41 : vector<1x1x1x8xf32> to vector<1x8xf32>
    %43 = vector.broadcast %42 : vector<1x8xf32> to vector<16x8xf32>
    %44 = arith.addf %40, %43 : vector<16x8xf32>
    %cst_36 = arith.constant dense<0xFF800000> : vector<16xf32>
    %45 = vector.multi_reduction <maximumf>, %44, %cst_36 [1] : vector<16x8xf32> to vector<16xf32>
    %46 = vector.shape_cast %45 : vector<16xf32> to vector<16x1xf32>
    %47 = vector.broadcast %46 : vector<16x1xf32> to vector<16x8xf32>
    %48 = arith.subf %44, %47 : vector<16x8xf32>
    %49 = math.exp %48 : vector<16x8xf32>
    %cst_37 = arith.constant dense<0.000000e+00> : vector<16xf32>
    %50 = vector.multi_reduction <add>, %49, %cst_37 [1] : vector<16x8xf32> to vector<16xf32>
    %51 = vector.shape_cast %50 : vector<16xf32> to vector<16x1xf32>
    %cst_38 = arith.constant 1.000000e+00 : f32
    %52 = vector.broadcast %cst_38 : f32 to vector<16x1xf32>
    %53 = arith.divf %52, %51 : vector<16x1xf32>
    %54 = vector.broadcast %53 : vector<16x1xf32> to vector<16x8xf32>
    %55 = arith.mulf %49, %54 : vector<16x8xf32>
    %56 = arith.truncf %55 : vector<16x8xf32> to vector<16x8xbf16>
    %c0_39 = arith.constant 0 : index
    %c1_40 = arith.constant 1 : index
    %c0_41 = arith.constant 0 : index
    %c0_42 = arith.constant 0 : index
    %57 = vector.load %arg4[%c0_39, %c1_40, %c0_41, %c0_42] : memref<1x3x8x128xbf16, #tpu.memory_space<vmem>>, vector<1x1x8x128xbf16>
    %58 = vector.shape_cast %57 : vector<1x1x8x128xbf16> to vector<8x128xbf16>
    %cst_43 = arith.constant dense<0.000000e+00> : vector<16x128xf32>
    %59 = tpu.matmul %56, %58, %cst_43 {dimension_numbers = #tpu.dot_dimension_numbers<[1], [0], [0], [1], [0, 0, 1, 1], [], []>} : vector<16x8xbf16>, vector<8x128xbf16>, vector<16x128xf32> -> vector<16x128xf32>
    %c0_44 = arith.constant 0 : index
    %c1_45 = arith.constant 1 : index
    %c0_46 = arith.constant 0 : index
    %c0_47 = arith.constant 0 : index
    %60 = vector.load %arg7[%c0_44, %c1_45, %c0_46, %c0_47] : memref<1x3x16x128xf32, #tpu.memory_space<vmem>>, vector<1x1x16x128xf32>
    %61 = vector.shape_cast %60 : vector<1x1x16x128xf32> to vector<16x128xf32>
    %62 = vector.shape_cast %59 : vector<16x128xf32> to vector<1x1x16x128xf32>
    tpu.vector_store %arg7[%c0_44, %c1_45, %c0_46, %c0_47], %62 {strides = array<i32>} : memref<1x3x16x128xf32, #tpu.memory_space<vmem>>, vector<1x1x16x128xf32>,
    %c0_48 = arith.constant 0 : index
    %c2 = arith.constant 2 : index
    %c0_49 = arith.constant 0 : index
    %c0_50 = arith.constant 0 : index
    %63 = vector.load %arg3[%c0_48, %c2, %c0_49, %c0_50] : memref<1x3x8x128xbf16, #tpu.memory_space<vmem>>, vector<1x1x8x128xbf16>
    %64 = vector.shape_cast %63 : vector<1x1x8x128xbf16> to vector<8x128xbf16>
    %cst_51 = arith.constant dense<0.000000e+00> : vector<8x128xf32>
    %65 = tpu.matmul %64, %0, %cst_51 {dimension_numbers = #tpu.dot_dimension_numbers<[1], [0], [0], [1], [0, 0, 1, 1], [], []>} : vector<8x128xbf16>, vector<128x128xbf16>, vector<8x128xf32> -> vector<8x128xf32>
    %cst_52 = arith.constant 0.000000e+00 : f32
    %66 = vector.broadcast %cst_52 : f32 to vector<8x128xf32>
    %67 = arith.maximumf %65, %66 : vector<8x128xf32>
    %68 = arith.truncf %67 : vector<8x128xf32> to vector<8x128xbf16>
    %cst_53 = arith.constant dense<0.000000e+00> : vector<16x8xf32>
    %69 = tpu.matmul %4, %68, %cst_53 {dimension_numbers = #tpu.dot_dimension_numbers<[1], [1], [0], [0], [0, 0, 1, 0], [], []>} : vector<16x128xbf16>, vector<8x128xbf16>, vector<16x8xf32> -> vector<16x8xf32>
    %c0_54 = arith.constant 0 : index
    %c2_55 = arith.constant 2 : index
    %c0_56 = arith.constant 0 : index
    %c0_57 = arith.constant 0 : index
    %70 = vector.load %arg5[%c0_54, %c2_55, %c0_56, %c0_57] : memref<1x3x1x8xf32, #tpu.memory_space<vmem>>, vector<1x1x1x8xf32>
    %71 = vector.shape_cast %70 : vector<1x1x1x8xf32> to vector<1x8xf32>
    %72 = vector.broadcast %71 : vector<1x8xf32> to vector<16x8xf32>
    %73 = arith.addf %69, %72 : vector<16x8xf32>
    %cst_58 = arith.constant dense<0xFF800000> : vector<16xf32>
    %74 = vector.multi_reduction <maximumf>, %73, %cst_58 [1] : vector<16x8xf32> to vector<16xf32>
    %75 = vector.shape_cast %74 : vector<16xf32> to vector<16x1xf32>
    %76 = vector.broadcast %75 : vector<16x1xf32> to vector<16x8xf32>
    %77 = arith.subf %73, %76 : vector<16x8xf32>
    %78 = math.exp %77 : vector<16x8xf32>
    %cst_59 = arith.constant dense<0.000000e+00> : vector<16xf32>
    %79 = vector.multi_reduction <add>, %78, %cst_59 [1] : vector<16x8xf32> to vector<16xf32>
    %80 = vector.shape_cast %79 : vector<16xf32> to vector<16x1xf32>
    %cst_60 = arith.constant 1.000000e+00 : f32
    %81 = vector.broadcast %cst_60 : f32 to vector<16x1xf32>
    %82 = arith.divf %81, %80 : vector<16x1xf32>
    %83 = vector.broadcast %82 : vector<16x1xf32> to vector<16x8xf32>
    %84 = arith.mulf %78, %83 : vector<16x8xf32>
    %85 = arith.truncf %84 : vector<16x8xf32> to vector<16x8xbf16>
    %c0_61 = arith.constant 0 : index
    %c2_62 = arith.constant 2 : index
    %c0_63 = arith.constant 0 : index
    %c0_64 = arith.constant 0 : index
    %86 = vector.load %arg4[%c0_61, %c2_62, %c0_63, %c0_64] : memref<1x3x8x128xbf16, #tpu.memory_space<vmem>>, vector<1x1x8x128xbf16>
    %87 = vector.shape_cast %86 : vector<1x1x8x128xbf16> to vector<8x128xbf16>
    %cst_65 = arith.constant dense<0.000000e+00> : vector<16x128xf32>
    %88 = tpu.matmul %85, %87, %cst_65 {dimension_numbers = #tpu.dot_dimension_numbers<[1], [0], [0], [1], [0, 0, 1, 1], [], []>} : vector<16x8xbf16>, vector<8x128xbf16>, vector<16x128xf32> -> vector<16x128xf32>
    %c0_66 = arith.constant 0 : index
    %c2_67 = arith.constant 2 : index
    %c0_68 = arith.constant 0 : index
    %c0_69 = arith.constant 0 : index
    %89 = vector.load %arg7[%c0_66, %c2_67, %c0_68, %c0_69] : memref<1x3x16x128xf32, #tpu.memory_space<vmem>>, vector<1x1x16x128xf32>
    %90 = vector.shape_cast %89 : vector<1x1x16x128xf32> to vector<16x128xf32>
    %91 = vector.shape_cast %88 : vector<16x128xf32> to vector<1x1x16x128xf32>
    tpu.vector_store %arg7[%c0_66, %c2_67, %c0_68, %c0_69], %91 {strides = array<i32>} : memref<1x3x16x128xf32, #tpu.memory_space<vmem>>, vector<1x1x16x128xf32>,
    return
  }
  func.func @transform_0(%arg0: i32, %arg1: i32) -> (i32, i32, i32, i32) {
    %c0_i32 = arith.constant 0 : i32
    %c0_i32_0 = arith.constant 0 : i32
    %c0_i32_1 = arith.constant 0 : i32
    %c0_i32_2 = arith.constant 0 : i32
    return %arg0, %c0_i32, %c0_i32_0, %c0_i32_1 : i32, i32, i32, i32
  }
  func.func @transform_1(%arg0: i32, %arg1: i32) -> (i32, i32, i32, i32) {
    %c0_i32 = arith.constant 0 : i32
    %c0_i32_0 = arith.constant 0 : i32
    %c0_i32_1 = arith.constant 0 : i32
    return %arg0, %arg1, %c0_i32, %c0_i32_0 : i32, i32, i32, i32
  }
  func.func @transform_2(%arg0: i32, %arg1: i32) -> (i32, i32, i32, i32) {
    %c0_i32 = arith.constant 0 : i32
    %c0_i32_0 = arith.constant 0 : i32
    %c0_i32_1 = arith.constant 0 : i32
    return %arg0, %arg1, %c0_i32, %c0_i32_0 : i32, i32, i32, i32
  }
  func.func @transform_3(%arg0: i32, %arg1: i32) -> (i32, i32, i32, i32) {
    %c0_i32 = arith.constant 0 : i32
    %c0_i32_0 = arith.constant 0 : i32
    %c0_i32_1 = arith.constant 0 : i32
    return %arg0, %arg1, %c0_i32, %c0_i32_0 : i32, i32, i32, i32
  }
  func.func @transform_4(%arg0: i32, %arg1: i32) -> (i32, i32) {
    %c0_i32 = arith.constant 0 : i32
    %c0_i32_0 = arith.constant 0 : i32
    %c0_i32_1 = arith.constant 0 : i32
    return %c0_i32, %c0_i32_0 : i32, i32
  }
  func.func @transform_5(%arg0: i32, %arg1: i32) -> (i32, i32, i32, i32) {
    %c0_i32 = arith.constant 0 : i32
    %c0_i32_0 = arith.constant 0 : i32
    %c0_i32_1 = arith.constant 0 : i32
    return %arg0, %arg1, %c0_i32, %c0_i32_0 : i32, i32, i32, i32
  }
}

</mosaic_0001>

<bundles_post_ra>
// kernel: tpu_custom_call.1
= control target key start
LH: loop header
LB: loop body
LE: loop exit
PB: predicated region body
PF: predicated region fallthrough
CT: control target
= control target key end

     0   :  { %s2318_s0 = inlined_call_operand.hbm [shape: bf16[2,1,16,128], index: 0, kind: input, shape index: {}]   ;;  %s2319_s1 = inlined_call_operand.hbm [shape: bf16[2,3,8,128], index: 1, kind: input, shape index: {}]   ;;  %s2320_s2 = inlined_call_operand.hbm [shape: bf16[2,3,8,128], index: 2, kind: input, shape index: {}]   ;;  %s2321_s3 = inlined_call_operand.vmem [shape: f32[2,3,1,8], index: 3, kind: input, shape index: {}]   ;;  %s2322_s4 = inlined_call_operand.hbm [shape: bf16[128,128], index: 4, kind: input, shape index: {}]   ;;  %s2323_s5 = inlined_call_operand.hbm [shape: f32[2,3,16,128], index: 5, kind: output, shape index: {}]  }
   0x1   :  { %2344 = sst [smem:[#allocation21_spill]] %s2319_s1 }
   0x2   :  { %10 = vsyncpa [#allocation4], 0 }
   0x3   :  { %12 = vsyncpa [#allocation4 + $0x1], 0 }
   0x4   :  { %13 = vsyncpa [#allocation7], 0 }
   0x5   :  { %15 = vsyncpa [#allocation7 + $0x1], 0 }
   0x6   :  { %16 = vsyncpa [#allocation10], 0 }
   0x7   :  { %17 = vsyncpa [#allocation5], 0 }
   0x8   :  { %19 = vsyncpa [#allocation5 + $0x1], 0  ;;  %s1842_s18 = smov 0   ;;  %s1844_s19 = smov 0  }
   0x9   :  { %s1846_s20 = smov 0   ;;  %s1848_s21 = smov 0  }
   0xa   :  { %s1850_s22 = smov 0   ;;  %s1852_s23 = smov 0  }
   0xb LB: > { %2345 = sst [smem:[#allocation16_spill]] %s1787_s20  ;;  %s37_s24 = sadd.s32 1, %s1795_s22  ;;  %s1799_s23 = sphi %s1852_s23, %s25_s23   ;;  %s1795_s22 = sphi %s1850_s22, %s2380_s22   ;;  %s1791_s21 = sphi %s1848_s21, %s2379_s21   ;;  %s1787_s20 = sphi %s1846_s20, %s2375_s20   ;;  %s1783_s19 = sphi %s1844_s19, %s2378_s19   ;;  %s1779_s18 = sphi %s1842_s18, %s2377_s18  }
   0xc   : > { %2346 = sst [smem:[#allocation17_spill]] %s1799_s23  ;;  %s44_s25 = sadd.s32 1, %s1787_s20 }
   0xd   : > { %p39_p0 = scmp.ge.s32.totalorder %s37_s24, 2  ;;  %p2324_p1 = scmp.ne.s32.totalorder %s1787_s20, %s1783_s19 }
   0xe   : > { %p52_p2 = scmp.eq.s32.totalorder %s1799_s23, 0  ;;  %p1500_p6 = scmp.lt.s32.totalorder %s1799_s23, 2 }
   0xf   : > { %s2382_s24 = smov (%p39_p0, %s37_s24), 0  ;;  %s1887_s27 = sand.u32 1, %s1787_s20  }
  0x10   : > { %2347 = sst [smem:[#allocation18_spill]] %s2382_s24  ;;  %p53_p3 = por %p52_p2, %p2324_p1 }
  0x11   : > { %s41_s26 = ssub.s32 %s1795_s22, %s2382_s24  ;;  %s248_s28 = sand.u32 1, %s1799_s23  }
  0x12   : > { %p42_p5 = scmp.eq.s32.totalorder %s41_s26, 0  ;;  %p1893_p7 = pnand %p1500_p6, %p53_p3 }
  0x13   : > { %s2325_s6 = smul.u32 12, %s1887_s27  ;;  %s2350_s1 = sld [smem:[#allocation21_spill]] }
  0x14   : > { %s1891_s29 = scalar_select %p42_p5, %s1787_s20, %s44_s25  }
  0x15   : > { %s2349_s30 = scalar_select %p1893_p7, 1, 0 }
  0x16   : > { %2348 = sst [smem:[#allocation19_spill]] %s1891_s29  ;;  %s2326_s7 = smul.u32 192, %s1795_s22 }
  0x17   : > { %s252_s11 = scalar_lea.vmem [#allocation6], %s2325_s6  ;;  %s1910_s13 = scalar_lea.sflag [#allocation7], %s248_s28 }
  0x18   : > { %s261_s12 = sshll.u32 %s252_s11, 4  ;;  %p1916_p9 = pneg %p1893_p7  ;;  %s1908_s12 = int_to_ptr.vmem [resolvable:$true] %s261_s12 }
  0x19   : > { %s1904_s10 = scalar_lea.hbm %s2350_s1, %s2326_s7  ;;  %s1596_s25 = scalar_lea.hbm %s2350_s1, 384 }
  0x1a   : > { %s1591_s14 = scalar_lea.hbm %s1904_s10, 192  ;;  %p1597_p12 = scmp.lt.u32.totalorder %s1904_s10, %s2350_s1 }
  0x1b   : > { %p1592_p8 = scmp.ne.s32.totalorder %s1904_s10, %s1591_s14  ;;  %p1598_p13 = scmp.lt.u32.totalorder %s1596_s25, %s1591_s14 }
  0x1c   : > { %s2351_s15 = scalar_select %p1916_p9, 1, 0 }
  0x1d   : > { %p1594_p10 = pnand %p1916_p9, %p1592_p8  ;;  %p1599_p0 = por %p1598_p13, %p1597_p12 }
  0x1e   : > { %p1600_p2 = scmp.lt.u32.totalorder %s1591_s14, %s1904_s10 }
  0x1f   : > { %p1595_p11 = pneg %p1594_p10 }
  0x20   : > { %p1601_p3 = por %p1600_p2, %p1599_p0 }
  0x22   : > { %p1602_p5 = pnand %p1601_p3, %p1595_p11 }
  0x24   : > { %1605 = shalt.err (!%p1602_p5)
}
  0x25   : > { %s1606_s28 = scalar_lea.vmem %s1908_s12, 192  ;;  %s1801_s9 = smov [#allocation6]  }
  0x26   : > { %p1607_p6 = scmp.ne.s32.totalorder %s1908_s12, %s1606_s28  ;;  %s1611_s11 = sshll.u32 %s1801_s9, 4  ;;  %s1612_s11 = int_to_ptr.vmem [resolvable:$false] %s1611_s11 }
  0x27   : > { %s1613_s16 = scalar_lea.vmem %s1612_s11, 384  ;;  %p1614_p4 = scmp.lt.s32.totalorder %s1908_s12, %s1612_s11 }
  0x28   : > { %p1609_p8 = pnand %p1607_p6, %p1916_p9  ;;  %p1615_p1 = scmp.lt.s32.totalorder %s1613_s16, %s1606_s28 }
  0x2a   : > { %p1610_p10 = pneg %p1609_p8  ;;  %p1616_p12 = por %p1615_p1, %p1614_p4 }
  0x2c   : > { %p1617_p13 = pnand %p1616_p12, %p1610_p10 }
  0x2e   : > { %1620 = shalt.err (!%p1617_p13)
}
  0x2f   : > { %s2327_s14 = smov 64   ;;  %s2329_s17 = smov 4  }
  0x30   : > { %1491 = dma.hbm_to_vmem [thread:$0]  (!%p1893_p7), %s1904_s10, 192, %s1908_s12, %s1910_s13, %s2327_s14, %s2327_s14, %s2329_s17  }
  0x31   : > { %s1944_s25 = sadd.s32 4294967295, %s1799_s23   ;;  %s1248_s26 = sadd.s32 4294967294, %s1799_s23  }
  0x32   : > { %p57_p1 = scmp.ne.s32.totalorder %s1783_s19, %s1779_s18  ;;  %p2336_p4 = scmp.eq.s32.totalorder %s1944_s25, 0 }
  0x33   : > { %p188_p11 = scmp.eq.s32.totalorder %s1944_s25, 1  ;;  %p194_p0 = scmp.eq.s32.totalorder %s1248_s26, 1 }
  0x34   : > { %p1249_p2 = scmp.ge.s32.totalorder %s1799_s23, 1  ;;  %p1954_p3 = por %p2336_p4, %p57_p1 }
  0x35   : > { %p2353_p5 = scmp.ne.s32.totalorder %s1787_s20, %s1783_s19  ;;  %p1965_p8 = por %p194_p0, %p57_p1 }
  0x36   : > { %s2352_s8 = scalar_select %p1954_p3, 1, 0 }
  0x37   : > { %p1961_p6 = por %p188_p11, %p2353_p5  ;;  %p201_p10 = scmp.lt.s32.totalorder %s1799_s23, 3 }
  0x38   : > { %s2355_s12 = scalar_select %p1965_p8, 1, 0 }
  0x39   : > { %s2354_s10 = scalar_select %p1961_p6, 1, 0 }
  0x3a   : > { %2356 = sst [smem:[#allocation20_spill]] %s2355_s12  ;;  %p1970_p12 = pnand %p1249_p2, %p201_p10 }
  0x3b   : > { %s1804_s9 = smov [#allocation9]   ;;  %s1252_s16 = sshll.u32 %s1887_s27, 3 }
  0x3c   : > { %s2357_s28 = scalar_select %p1970_p12, 1, 0 }
  0x3d   : > { %s213_s11 = sshll.u32 %s1804_s9, 4  ;;  %p1481_p13 = pneg %p1970_p12  ;;  %s1974_s11 = int_to_ptr.vmem [resolvable:$true] %s213_s11 }
  0x3e   : > { %s1296_s26 = sshll.u32 %s1795_s22, 7  ;;  %s231_s1 = scalar_lea.vmem [#allocation3], %s1252_s16 }
  0x3f   : > { %p1982_p11 = pnand %p1481_p13, %p2336_p4  ;;  %s1989_s17 = scalar_lea.hbm %s2318_s0, %s1296_s26 }
  0x40   : > { %s238_s24 = sshll.u32 %s231_s1, 4  ;;  %s1621_s20 = scalar_lea.hbm %s2322_s4, 1024  ;;  %s1991_s24 = int_to_ptr.vmem [resolvable:$true] %s238_s24 }
  0x41   : > { %p1622_p1 = scmp.ne.s32.totalorder %s2322_s4, %s1621_s20  ;;  %p1623_p0 = pneg %p1982_p11 }
  0x42   : > { %p1628_p10 = scmp.lt.u32.totalorder %s1621_s20, %s2322_s4 }
  0x43   : > { %p1624_p2 = pnand %p1623_p0, %p1622_p1 }
  0x45   : > { %p1625_p5 = pneg %p1624_p2 }
  0x47   : > { %p1630_p13 = pnand %p1628_p10, %p1625_p5 }
  0x49   : > { %1633 = shalt.err (!%p1630_p13)
}
  0x4a   : > { %s1634_s1 = scalar_lea.vmem %s1974_s11, 1024  ;;  %p1642_p3 = scmp.lt.s32.totalorder %s1974_s11, %s1974_s11 }
  0x4b   : > { %p1635_p4 = scmp.ne.s32.totalorder %s1974_s11, %s1634_s1  ;;  %p1643_p12 = scmp.lt.s32.totalorder %s1634_s1, %s1634_s1 }
  0x4d   : > { %p1637_p8 = pnand %p1635_p4, %p1623_p0  ;;  %p1644_p7 = por %p1643_p12, %p1642_p3 }
  0x4f   : > { %p1638_p6 = pneg %p1637_p8 }
  0x51   : > { %p1645_p9 = pnand %p1644_p7, %p1638_p6 }
  0x53   : > { %1648 = shalt.err (!%p1645_p9)
}
  0x54   : > { %s2359_s23 = smov 4   ;;  %s2360_s29 = smov 64  }
  0x55   : > { %1484 = dma.hbm_to_vmem [thread:$0]  (!%p1982_p11), %s2322_s4, 1024, %s1974_s11, [#allocation10], %s2360_s29, %s2360_s29, %s2359_s23  }
  0x56   : > { %s228_s16 = scalar_lea.sflag [#allocation4], %s1887_s27  ;;  %s1649_s26 = scalar_lea.hbm %s1989_s17, 128 }
  0x57   : > { %p1650_p7 = scmp.ne.s32.totalorder %s1989_s17, %s1649_s26  ;;  %p2361_p9 = scmp.ne.s32.totalorder %s2351_s15, 0 }
  0x58   : > { %s1654_s7 = scalar_lea.hbm %s2318_s0, 256  ;;  %p1655_p6 = scmp.lt.u32.totalorder %s1989_s17, %s2318_s0 }
  0x59   : > { %p1652_p4 = pnand %p1650_p7, %p2361_p9  ;;  %p1656_p8 = scmp.lt.u32.totalorder %s1654_s7, %s1649_s26 }
  0x5a   : > { %p1658_p1 = scmp.lt.u32.totalorder %s1649_s26, %s1989_s17 }
  0x5b   : > { %p1653_p3 = pneg %p1652_p4  ;;  %p1657_p12 = por %p1656_p8, %p1655_p6 }
  0x5d   : > { %p1659_p0 = por %p1658_p1, %p1657_p12 }
  0x5f   : > { %p1660_p2 = pnand %p1659_p0, %p1653_p3 }
  0x61   : > { %1663 = shalt.err (!%p1660_p2)
}
  0x62   : > { %s1664_s11 = scalar_lea.vmem %s1991_s24, 128  ;;  %s1805_s20 = smov [#allocation3]  }
  0x63   : > { %p1665_p11 = scmp.ne.s32.totalorder %s1991_s24, %s1664_s11  ;;  %s1669_s12 = sshll.u32 %s1805_s20, 4  ;;  %s1670_s12 = int_to_ptr.vmem [resolvable:$false] %s1669_s12 }
  0x64   : > { %s1671_s6 = scalar_lea.vmem %s1670_s12, 256  ;;  %p1672_p13 = scmp.lt.s32.totalorder %s1991_s24, %s1670_s12 }
  0x65   : > { %p1667_p5 = pnand %p1665_p11, %p2361_p9  ;;  %p1673_p7 = scmp.lt.s32.totalorder %s1671_s6, %s1664_s11 }
  0x67   : > { %p1668_p10 = pneg %p1667_p5  ;;  %p1674_p4 = por %p1673_p7, %p1672_p13 }
  0x69   : > { %p1675_p6 = pnand %p1674_p4, %p1668_p10 }
  0x6b   : > { %1678 = shalt.err (!%p1675_p6)
}
  0x6c   : > { %p2362_p3 = scmp.ne.s32.totalorder %s2349_s30, 0  ;;  %s2363_s26 = smul.u32 192, %s1795_s22 }
  0x6d   : > { %s2364_s1 = smul.u32 12, %s1887_s27 }
  0x6e   : > { %1488 = dma.hbm_to_vmem [thread:$0]  (!%p2362_p3), %s1989_s17, 128, %s1991_s24, %s228_s16, %s2360_s29, %s2360_s29, %s2359_s23  }
  0x6f   : > { %s2049_s14 = scalar_lea.hbm %s2320_s2, %s2363_s26  ;;  %s275_s11 = scalar_lea.vmem [#allocation8], %s2364_s1 }
  0x70   : > { %s284_s20 = sshll.u32 %s275_s11, 4  ;;  %s1679_s12 = scalar_lea.hbm %s2049_s14, 192  ;;  %s2053_s20 = int_to_ptr.vmem [resolvable:$true] %s284_s20 }
  0x71   : > { %p1680_p8 = scmp.ne.s32.totalorder %s2049_s14, %s1679_s12  ;;  %s1684_s16 = scalar_lea.hbm %s2320_s2, 384 }
  0x72   : > { %p1685_p0 = scmp.lt.u32.totalorder %s2049_s14, %s2320_s2  ;;  %p1686_p2 = scmp.lt.u32.totalorder %s1684_s16, %s1679_s12 }
  0x73   : > { %p1682_p12 = pnand %p1680_p8, %p2361_p9  ;;  %p1688_p5 = scmp.lt.u32.totalorder %s1679_s12, %s2049_s14 }
  0x74   : > { %p1687_p11 = por %p1686_p2, %p1685_p0 }
  0x75   : > { %p1683_p1 = pneg %p1682_p12 }
  0x76   : > { %p1689_p10 = por %p1688_p5, %p1687_p11 }
  0x78   : > { %p1690_p13 = pnand %p1689_p10, %p1683_p1 }
  0x7a   : > { %1693 = shalt.err (!%p1690_p13)
}
  0x7b   : > { %s1694_s27 = scalar_lea.vmem %s2053_s20, 192  ;;  %s1806_s9 = smov [#allocation8]  }
  0x7c   : > { %p1695_p7 = scmp.ne.s32.totalorder %s2053_s20, %s1694_s27  ;;  %s1699_s7 = sshll.u32 %s1806_s9, 4  ;;  %s1700_s7 = int_to_ptr.vmem [resolvable:$false] %s1699_s7 }
  0x7d   : > { %s1701_s1 = scalar_lea.vmem %s1700_s7, 384  ;;  %p1702_p8 = scmp.lt.s32.totalorder %s2053_s20, %s1700_s7 }
  0x7e   : > { %p1697_p4 = pnand %p1695_p7, %p2361_p9  ;;  %p1703_p12 = scmp.lt.s32.totalorder %s1701_s1, %s1694_s27 }
  0x80   : > { %p1698_p6 = pneg %p1697_p4  ;;  %p1704_p0 = por %p1703_p12, %p1702_p8 }
  0x82   : > { %p1705_p2 = pnand %p1704_p0, %p1698_p6 }
  0x84   : > { %1708 = shalt.err (!%p1705_p2)
}
  0x85   : > { %1494 = dma.hbm_to_vmem [thread:$0]  (!%p2362_p3), %s2049_s14, 192, %s2053_s20, %s1910_s13, %s2360_s29, %s2360_s29, %s2359_s23  }
  0x86   : > { %p2365_p9 = scmp.ne.s32.totalorder %s2357_s28, 0 }
  0x87   : > { %s2083_s15 = sand.u32 (!%p2365_p9), 1, %s1783_s19   ;;  %p2366_p1 = scmp.ne.s32.totalorder (!%p2365_p9), %s2352_s8, 0 }
  0x88   : > { %308 = sbr.rel (%p2365_p9) target bundleno = 2498 (0x9c2), region = 40  ;;  %s1258_s11 = sshll.u32 (!%p2365_p9), %s2083_s15, 3 }
  0x89   : > { %s311_s12 = scalar_lea.sflag (!%p2365_p9), [#allocation4], %s2083_s15  ;;  %s2087_s24 = scalar_lea.vmem (!%p2365_p9), [#allocation3], %s1258_s11 }
  0x8f   : > { %1762 = dma.done.wait (%p2366_p1), %s311_s12, 128  }
  0x90   : > { %1764 = vsyncadd (%p2366_p1), %s311_s12, 4294967168  ;;  %s319_s30 = sand.u32 1, %s1944_s25   ;;  %s1465_s13 = smul.u32 12, %s2083_s15 }
  0x91   : > { %s320_s28 = scalar_lea.sflag [#allocation7], %s319_s30 }
  0x92   : > { %s2095_s23 = scalar_lea.vmem [#allocation6], %s1465_s13 }
  0x93   : > { %1766 = dma.done.wait (%p2366_p1), %s320_s28, 384  }
  0x94   : > { %1768 = vsyncadd (%p2366_p1), %s320_s28, 4294966912  ;;  %s2101_s29 = scalar_lea.vmem [#allocation8], %s1465_s13  ;;  %p2367_p3 = scmp.eq.s32.totalorder %s1944_s25, 0 }
  0x96   : > { %1770 = dma.done.wait (%p2367_p3), [#allocation10], 1024   ;;  %p2368_p11 = pmov %p2367_p3 }
  0x97   : > { %v1807_v0 = vmov 0.0   ;;  %vm1808_vm0 = vmmov 0   ;;  %v2113_v1 = vld [vmem:[#allocation9] sm:$0xff]   ;;  %v2117_v2 = vld [vmem:[#allocation9 + $0x8] sm:$0xff]   ;;  %v2123_v3 = vld [vmem:[#allocation9 + $0x10] sm:$0xff]   ;;  %p384_p5 = scmp.lt.s32.totalorder %s1791_s21, 1 }
  0x98   : > { %1772 = vsyncadd (%p2368_p11), [#allocation10], 4294966272  ;;  %1365 = vmatprep.subr.bf16.mxu1 %v1807_v0  ;;  %1345 = vmatprep.subr.bf16.mxu0 %v1807_v0  ;;  %v2129_v4 = vld [vmem:[#allocation9 + $0x18] sm:$0xff]   ;;  %v2135_v5 = vld [vmem:[#allocation9 + $0x20] sm:$0xff]   ;;  %vm655_vm1 = vcmask 64512   ;;  %vm685_vm2 = vcmask 1043456  }
  0x99   : > { %1381 = vmatprep.mubr.msk.bf16.mxu1 %vm1808_vm0, %v1807_v0  ;;  %1361 = vmatprep.mubr.msk.bf16.mxu0 %vm1808_vm0, %v1807_v0  ;;  %v2141_v6 = vld [vmem:[#allocation9 + $0x28] sm:$0xff]   ;;  %v2147_v7 = vld [vmem:[#allocation9 + $0x30] sm:$0xff]   ;;  %v2153_v8 = vld [vmem:[#allocation9 + $0x38] sm:$0xff]   ;;  %s385_s25 = scalar_select %p384_p5, %s1791_s21, 1 }
  0x9a   : > { %1366 = vmatpush3.bf16.msra.mxu1 %v2113_v1  ;;  %1346 = vmatpush3.bf16.msra.mxu0 %v2113_v1  ;;  %v1566_v9 = vld [vmem:[%s2087_s24] sm:$0xff]   ;;  %v516_v10 = vld [vmem:[%s2095_s23] sm:$0xf]  ;;  %v1279_v24 = vld [vmem:[%s2095_s23 + $0x4] sm:$0xf]  ;;  %s1466_s16 = smul.u32 48, %s2083_s15 }
  0x9b   : > { %1367 = vmatprep.subr.bf16.mxu1 %v1807_v0  ;;  %1347 = vmatprep.subr.bf16.mxu0 %v1807_v0  ;;  %s1467_s8 = smul.u32 3, %s385_s25  ;;  %v681_v44 = vld [vmem:[%s2101_s29] sm:$0xf]  ;;  %s1073_s11 = scalar_lea.sflag [#allocation5], %s2083_s15 }
  0x9c   : > { %v687_v45 = vsel %vm685_vm2, %v681_v44, 0  ;;  %s2215_s6 = scalar_lea.vmem [#allocation11], %s1466_s16  ;;  %s1468_s27 = smul.u32 768, %s1791_s21 }
  0x9d   : > { %s2197_s17 = scalar_lea.vmem %s2321_s3, %s1467_s8  ;;  %s1089_s26 = sshll.u32 %s2215_s6, 4  ;;  %s2262_s26 = int_to_ptr.vmem [resolvable:$true] %s1089_s26 }
  0x9e   : > { %1368 = vmatpush3.bf16.msra.mxu1 %v2117_v2  ;;  %1348 = vmatpush3.bf16.msra.mxu0 %v2117_v2  ;;  %v1277_v25 = vld [vmem:[%s2197_s17] ss:$0 sm:$0xff]  ;;  %v1281_v63 = vld [vmem:[%s2197_s17 + $0x1] ss:$0 sm:$0xff]  ;;  %s2267_s1 = scalar_lea.hbm %s2323_s5, %s1468_s27  ;;  %s1709_s12 = scalar_lea.vmem %s2262_s26, 768 }
  0x9f   : > { %1369 = vmatprep.subr.bf16.mxu1 %v1807_v0  ;;  %1349 = vmatprep.subr.bf16.mxu0 %v1807_v0  ;;  %p1710_p10 = scmp.ne.s32.totalorder %s2262_s26, %s1709_s12  ;;  %p2369_p13 = scmp.ne.s32.totalorder %s2354_s10, 0 }
  0xa0   : > { %s1809_s21 = smov [#allocation11]  }
  0xa1   : > { %p1711_p7 = pnand %p1710_p10, %p2369_p13  ;;  %s1713_s24 = sshll.u32 %s1809_s21, 4  ;;  %s1714_s24 = int_to_ptr.vmem [resolvable:$false] %s1713_s24 }
  0xa2   : > { %1370 = vmatpush3.bf16.msra.mxu1 %v2123_v3  ;;  %1350 = vmatpush3.bf16.msra.mxu0 %v2123_v3  ;;  %s1715_s30 = scalar_lea.vmem %s1714_s24, 1536  ;;  %p1716_p6 = scmp.lt.s32.totalorder %s2262_s26, %s1714_s24 }
  0xa3   : > { %1371 = vmatprep.subr.bf16.mxu1 %v1807_v0  ;;  %1351 = vmatprep.subr.bf16.mxu0 %v1807_v0  ;;  %p1712_p4 = pneg %p1711_p7  ;;  %p1717_p8 = scmp.lt.s32.totalorder %s1715_s30, %s1709_s12 }
  0xa5   : > { %p1718_p12 = por %p1717_p8, %p1716_p6 }
  0xa6   : > { %1372 = vmatpush3.bf16.msra.mxu1 %v2129_v4  ;;  %1352 = vmatpush3.bf16.msra.mxu0 %v2129_v4 }
  0xa7   : > { %1373 = vmatprep.subr.bf16.mxu1 %v1807_v0  ;;  %1353 = vmatprep.subr.bf16.mxu0 %v1807_v0  ;;  %p1719_p0 = pnand %p1718_p12, %p1712_p4 }
  0xaa   : > { %1374 = vmatpush3.bf16.msra.mxu1 %v2135_v5  ;;  %1354 = vmatpush3.bf16.msra.mxu0 %v2135_v5 }
  0xab   : > { %1375 = vmatprep.subr.bf16.mxu1 %v1807_v0  ;;  %1355 = vmatprep.subr.bf16.mxu0 %v1807_v0 }
  0xae   : > { %1376 = vmatpush3.bf16.msra.mxu1 %v2141_v6  ;;  %1356 = vmatpush3.bf16.msra.mxu0 %v2141_v6 }
  0xaf   : > { %1377 = vmatprep.subr.bf16.mxu1 %v1807_v0  ;;  %1357 = vmatprep.subr.bf16.mxu0 %v1807_v0 }
  0xb2   : > { %1378 = vmatpush3.bf16.msra.mxu1 %v2147_v7  ;;  %1358 = vmatpush3.bf16.msra.mxu0 %v2147_v7 }
  0xb3   : > { %1379 = vmatprep.subr.bf16.mxu1 %v1807_v0  ;;  %1359 = vmatprep.subr.bf16.mxu0 %v1807_v0 }
  0xb6   : > { %1380 = vmatpush3.bf16.msra.mxu1 %v2153_v8  ;;  %1360 = vmatpush3.bf16.msra.mxu0 %v2153_v8 }
  0xb7   : > { %1385 = vmatprep.subr.bf16.mxu0 %v1807_v0  ;;  %1391 = vmatprep.subr.bf16.mxu1 %v1807_v0 }
  0xb9   : > { %1382 = vmatmul.mubr.bf16.vlgmr.msra.gmra.mrb[0].mxu1 %v516_v10  ;;  %1362 = vmatmul.mubr.bf16.vlgmr.msra.gmra.mrb[0].mxu0 %v1566_v9 }
  0xba   : > { %1387 = vmatprep.mubr.msk.bf16.mxu0 %vm1808_vm0, %v1807_v0  ;;  %1393 = vmatprep.mubr.msk.bf16.mxu1 %vm1808_vm0, %v1807_v0 }
  0xbb   : > { %1392 = vmatpush3.bf16.msra.mxu1 %v687_v45 }
  0xbc   : > { %1417 = vmatprep.subr.bf16.mxu1 %v1807_v0 }
 0x18c   : > { %v599_v11 = vpop.f32.mrb[0].mxu1  ;;  %v504_v12 = vpop.f32.mrb[0].mxu0 }
 0x18d   : > { %v605_v13 = vmax.f32 %v599_v11, 0.0  ;;  %v1383_v14 = vpop.f32.mrb[1].mxu1  ;;  %v511_v15 = vmax.f32 %v504_v12, 0.0  ;;  %v1363_v16 = vpop.f32.mrb[1].mxu0 }
 0x18e   : > { %v602_v17 = vpop.f32.mrb[2].mxu1  ;;  %v507_v18 = vpop.f32.mrb[2].mxu0 }
 0x18f   : > { %v606_v19 = vpack.c.bf16 %v605_v13, %v605_v13  ;;  %v1384_v20 = vpop.f32.mrb[3].mxu1  ;;  %v512_v21 = vmax.f32 %v507_v18, 0.0  ;;  %v1364_v22 = vpop.f32.mrb[3].mxu0 }
 0x191   : > { %v2167_v23 = vpack.c.bf16 %v512_v21, %v511_v15  ;;  %1386 = vmatpush3.bf16.xpose.msra.mxu0 %v606_v19 }
 0x192   : > { %1397 = vmatprep.subr.bf16.mxu0 %v1807_v0 }
 0x198   : > { %1388 = vmatmul.mubr.bf16.vlgmr.msra.gmra.mrb[4].mxu0 %v2167_v23 }
 0x199   : > { %1398 = vmatpush3.bf16.msra.mxu0 %v2113_v1  ;;  %1413 = vmatprep.mubr.msk.bf16.mxu0 %vm1808_vm0, %v1807_v0 }
 0x19a   : > { %1399 = vmatprep.subr.bf16.mxu0 %v1807_v0 }
 0x19d   : > { %1400 = vmatpush3.bf16.msra.mxu0 %v2117_v2 }
 0x19e   : > { %1401 = vmatprep.subr.bf16.mxu0 %v1807_v0 }
 0x1a1   : > { %1402 = vmatpush3.bf16.msra.mxu0 %v2123_v3 }
 0x1a2   : > { %1403 = vmatprep.subr.bf16.mxu0 %v1807_v0 }
 0x1a5   : > { %1404 = vmatpush3.bf16.msra.mxu0 %v2129_v4 }
 0x1a6   : > { %1405 = vmatprep.subr.bf16.mxu0 %v1807_v0 }
 0x1a9   : > { %1406 = vmatpush3.bf16.msra.mxu0 %v2135_v5 }
 0x1aa   : > { %1407 = vmatprep.subr.bf16.mxu0 %v1807_v0 }
 0x1ad   : > { %1408 = vmatpush3.bf16.msra.mxu0 %v2141_v6 }
 0x1ae   : > { %1409 = vmatprep.subr.bf16.mxu0 %v1807_v0 }
 0x1b1   : > { %1410 = vmatpush3.bf16.msra.mxu0 %v2147_v7 }
 0x1b2   : > { %1411 = vmatprep.subr.bf16.mxu0 %v1807_v0 }
 0x1b5   : > { %1412 = vmatpush3.bf16.msra.mxu0 %v2153_v8 }
 0x1b6   : > { %1449 = vmatprep.subr.bf16.mxu0 %v1807_v0 }
 0x1b8   : > { %1414 = vmatmul.mubr.bf16.vlgmr.msra.gmra.mrb[8].mxu0 %v1279_v24 }
 0x1b9   : > { %1451 = vmatprep.mubr.msk.bf16.mxu0 %vm1808_vm0, %v1807_v0 }
 0x26b   : > { %v648_v26 = vpop.f32.mrb[4].mxu0 }
 0x26c   : > { %v649_v27 = vadd.f32 %v1277_v25, %v648_v26  ;;  %v1389_v28 = vpop.f32.mrb[5].mxu0 }
 0x26d   : > { %v651_v29 = vpop.f32.mrb[6].mxu0  ;;  %v1282_v28 = vld [vmem:[%s2101_s29 + $0x4] sm:$0xf] }
 0x26e   : > { %v652_v30 = vadd.f32 %v1277_v25, %v651_v29  ;;  %v1390_v31 = vpop.f32.mrb[7].mxu0  ;;  %v656_v32 = vsel %vm655_vm1, %v649_v27, -inf  ;;  %v856_v29 = vsel %vm685_vm2, %v1282_v28, 0 }
 0x26f   : > { %657 = vmax.xlane.f32.xlu0 %v656_v32 }
 0x270   : > { %v659_v33 = vsel %vm655_vm1, %v652_v30, -inf }
 0x273   : > { %660 = vmax.xlane.f32.xlu0 %v659_v33 }
 0x28b   : > { %v768_v46 = vpop.f32.mrb[8].mxu0 }
 0x28c   : > { %v1415_v47 = vpop.f32.mrb[9].mxu0  ;;  %v774_v53 = vmax.f32 %v768_v46, 0.0 }
 0x28d   : > { %v771_v48 = vpop.f32.mrb[10].mxu0 }
 0x28e   : > { %v1416_v49 = vpop.f32.mrb[11].mxu0  ;;  %v775_v57 = vpack.c.bf16 %v774_v53, %v774_v53 }
 0x2fc   : > { %v658_v34 = vpop.xlane.xlu0 %657 }
 0x2fd   : > { %v662_v35 = vsub.f32 %v649_v27, %v658_v34 }
 0x2ff   : > { %v664_v36 = vmul.f32 1.442695, %v662_v35 }
 0x300   : > { %v661_v37 = vpop.xlane.xlu0 %660 }
 0x301   : > { %1567 = vpow2.f32 %v664_v36  ;;  %v663_v38 = vsub.f32 %v652_v30, %v661_v37 }
 0x303   : > { %v666_v39 = vmul.f32 1.442695, %v663_v38 }
 0x305   : > { %1569 = vpow2.f32 %v666_v39 }
 0x30b   : > { %v1568_v40 = vpop.eup %1567 }
 0x30c   : > { %v668_v41 = vsel %vm655_vm1, %v1568_v40, 0.0 }
 0x30d   : > { %669 = vadd.xlane.f32.xlu1 %v668_v41 }
 0x30f   : > { %v1570_v42 = vpop.eup %1569 }
 0x310   : > { %v671_v43 = vsel %vm655_vm1, %v1570_v42, 0.0 }
 0x311   : > { %672 = vadd.xlane.f32.xlu1 %v671_v43 }
 0x39a   : > { %v670_v50 = vpop.xlane.xlu1 %669 }
 0x39b   : > { %1571 = vrcp.f32 %v670_v50 }
 0x39e   : > { %v673_v51 = vpop.xlane.xlu1 %672 }
 0x39f   : > { %1573 = vrcp.f32 %v673_v51 }
 0x3a5   : > { %v1572_v52 = vpop.eup %1571 }
 0x3a6   : > { %v678_v55 = vmul.f32 %v1572_v52, %v1568_v40 }
 0x3a9   : > { %v1574_v54 = vpop.eup %1573 }
 0x3aa   : > { %v679_v56 = vmul.f32 %v1574_v54, %v1570_v42 }
 0x3ac   : > { %v680_v58 = vpack.c.bf16 %v679_v56, %v678_v55 }
 0x3ae   : > { %1394 = vmatmul.mubr.msk.bf16.vlgmr.msra.gmra.mrb[4].mxu1 %vm655_vm1, %v680_v58 }
 0x3af   : > { %1418 = vmatpush3.bf16.xpose.msra.mxu1 %v775_v57  ;;  %1419 = vmatprep.mubr.msk.bf16.mxu1 %vm1808_vm0, %v1807_v0  ;;  %v1289_v57 = vld [vmem:[%s2101_s29 + $0x8] sm:$0xf] }
 0x3b0   : > { %1423 = vmatprep.subr.bf16.mxu1 %v1807_v0  ;;  %v1026_v58 = vsel %vm685_vm2, %v1289_v57, 0 }
 0x3b6   : > { %1420 = vmatmul.mubr.bf16.vlgmr.msra.gmra.mrb[8].mxu1 %v2167_v23 }
 0x3b7   : > { %1425 = vmatprep.mubr.msk.bf16.mxu1 %vm1808_vm0, %v1807_v0  ;;  %1424 = vmatpush3.bf16.msra.mxu1 %v856_v29 }
 0x3b8   : > { %1429 = vmatprep.subr.bf16.mxu1 %v1807_v0 }
 0x481   : > { %v723_v59 = vpop.f32.mrb[4].mxu1 }
 0x482   : > { %730 = vst [vmem:[%s2215_s6] sm:$0xff] %v723_v59  ;;  %v1395_v60 = vpop.f32.mrb[5].mxu1 }
 0x483   : > { %v726_v61 = vpop.f32.mrb[6].mxu1 }
 0x484   : > { %731 = vst [vmem:[%s2215_s6 + $0x8] sm:$0xff] %v726_v61  ;;  %v1396_v62 = vpop.f32.mrb[7].mxu1 }
 0x489   : > { %v818_v9 = vpop.f32.mrb[8].mxu1 }
 0x48a   : > { %v819_v10 = vadd.f32 %v1281_v63, %v818_v9  ;;  %v1421_v11 = vpop.f32.mrb[9].mxu1 }
 0x48b   : > { %v821_v12 = vpop.f32.mrb[10].mxu1 }
 0x48c   : > { %v822_v13 = vadd.f32 %v1281_v63, %v821_v12  ;;  %v1422_v14 = vpop.f32.mrb[11].mxu1  ;;  %v825_v15 = vsel %vm655_vm1, %v819_v10, -inf }
 0x48d   : > { %826 = vmax.xlane.f32.xlu0 %v825_v15 }
 0x48e   : > { %v828_v16 = vsel %vm655_vm1, %v822_v13, -inf }
 0x48f   : > { %829 = vmax.xlane.f32.xlu1 %v828_v16 }
 0x51a   : > { %v827_v17 = vpop.xlane.xlu0 %826 }
 0x51b   : > { %v831_v18 = vsub.f32 %v819_v10, %v827_v17 }
 0x51c   : > { %v830_v19 = vpop.xlane.xlu1 %829 }
 0x51d   : > { %v833_v20 = vmul.f32 1.442695, %v831_v18  ;;  %v832_v21 = vsub.f32 %v822_v13, %v830_v19 }
 0x51f   : > { %1575 = vpow2.f32 %v833_v20  ;;  %v835_v22 = vmul.f32 1.442695, %v832_v21 }
 0x521   : > { %1577 = vpow2.f32 %v835_v22 }
 0x529   : > { %v1576_v24 = vpop.eup %1575 }
 0x52a   : > { %v837_v25 = vsel %vm655_vm1, %v1576_v24, 0.0 }
 0x52b   : > { %v1578_v26 = vpop.eup %1577  ;;  %838 = vadd.xlane.f32.xlu0 %v837_v25 }
 0x52c   : > { %v840_v27 = vsel %vm655_vm1, %v1578_v26, 0.0 }
 0x52d   : > { %841 = vadd.xlane.f32.xlu1 %v840_v27 }
 0x5b8   : > { %v839_v30 = vpop.xlane.xlu0 %838 }
 0x5b9   : > { %1579 = vrcp.f32 %v839_v30 }
 0x5ba   : > { %v842_v31 = vpop.xlane.xlu1 %841 }
 0x5bb   : > { %1581 = vrcp.f32 %v842_v31 }
 0x5c3   : > { %v1580_v32 = vpop.eup %1579 }
 0x5c4   : > { %v847_v34 = vmul.f32 %v1580_v32, %v1576_v24 }
 0x5c5   : > { %v1582_v33 = vpop.eup %1581 }
 0x5c6   : > { %v848_v35 = vmul.f32 %v1582_v33, %v1578_v26 }
 0x5c8   : > { %v849_v36 = vpack.c.bf16 %v848_v35, %v847_v34 }
 0x5ca   : > { %1426 = vmatmul.mubr.msk.bf16.vlgmr.msra.gmra.mrb[12].mxu1 %vm655_vm1, %v849_v36 }
 0x5cb   : > { %1430 = vmatpush3.bf16.msra.mxu1 %v2113_v1  ;;  %1445 = vmatprep.mubr.msk.bf16.mxu1 %vm1808_vm0, %v1807_v0  ;;  %v1286_v1 = vld [vmem:[%s2095_s23 + $0x8] sm:$0xf] }
 0x5cc   : > { %1431 = vmatprep.subr.bf16.mxu1 %v1807_v0 }
 0x5cf   : > { %1432 = vmatpush3.bf16.msra.mxu1 %v2117_v2 }
 0x5d0   : > { %1433 = vmatprep.subr.bf16.mxu1 %v1807_v0 }
 0x5d3   : > { %1434 = vmatpush3.bf16.msra.mxu1 %v2123_v3 }
 0x5d4   : > { %1435 = vmatprep.subr.bf16.mxu1 %v1807_v0 }
 0x5d7   : > { %1436 = vmatpush3.bf16.msra.mxu1 %v2129_v4 }
 0x5d8   : > { %1437 = vmatprep.subr.bf16.mxu1 %v1807_v0 }
 0x5db   : > { %1438 = vmatpush3.bf16.msra.mxu1 %v2135_v5 }
 0x5dc   : > { %1439 = vmatprep.subr.bf16.mxu1 %v1807_v0 }
 0x5df   : > { %1440 = vmatpush3.bf16.msra.mxu1 %v2141_v6 }
 0x5e0   : > { %1441 = vmatprep.subr.bf16.mxu1 %v1807_v0 }
 0x5e3   : > { %1442 = vmatpush3.bf16.msra.mxu1 %v2147_v7  ;;  %v1288_v7 = vld [vmem:[%s2197_s17 + $0x2] ss:$0 sm:$0xff] }
 0x5e4   : > { %1443 = vmatprep.subr.bf16.mxu1 %v1807_v0 }
 0x5e7   : > { %1444 = vmatpush3.bf16.msra.mxu1 %v2153_v8 }
 0x5ea   : > { %1446 = vmatmul.mubr.bf16.vlgmr.msra.gmra.mrb[16].mxu1 %v1286_v1 }
 0x69d   : > { %v892_v2 = vpop.f32.mrb[12].mxu1 }
 0x69e   : > { %1284 = vst [vmem:[%s2215_s6 + $0x10] sm:$0xff] %v892_v2  ;;  %v1427_v3 = vpop.f32.mrb[13].mxu1 }
 0x69f   : > { %v895_v4 = vpop.f32.mrb[14].mxu1 }
 0x6a0   : > { %1285 = vst [vmem:[%s2215_s6 + $0x18] sm:$0xff] %v895_v4  ;;  %v1428_v5 = vpop.f32.mrb[15].mxu1 }
 0x6bd   : > { %v938_v37 = vpop.f32.mrb[16].mxu1 }
 0x6be   : > { %v944_v38 = vmax.f32 %v938_v37, 0.0  ;;  %v1447_v6 = vpop.f32.mrb[17].mxu1 }
 0x6bf   : > { %v941_v39 = vpop.f32.mrb[18].mxu1 }
 0x6c0   : > { %v945_v40 = vpack.c.bf16 %v944_v38, %v944_v38  ;;  %v1448_v41 = vpop.f32.mrb[19].mxu1 }
 0x6c2   : > { %1450 = vmatpush3.bf16.xpose.msra.mxu0 %v945_v40 }
 0x6c3   : > { %1455 = vmatprep.subr.bf16.mxu0 %v1807_v0 }
 0x6c9   : > { %1452 = vmatmul.mubr.bf16.vlgmr.msra.gmra.mrb[12].mxu0 %v2167_v23 }
 0x6ca   : > { %1457 = vmatprep.mubr.msk.bf16.mxu0 %vm1808_vm0, %v1807_v0  ;;  %1456 = vmatpush3.bf16.msra.mxu0 %v1026_v58 }
 0x79c   : > { %v988_v8 = vpop.f32.mrb[12].mxu0 }
 0x79d   : > { %v989_v42 = vadd.f32 %v1288_v7, %v988_v8  ;;  %v1453_v43 = vpop.f32.mrb[13].mxu0 }
 0x79e   : > { %v991_v44 = vpop.f32.mrb[14].mxu0 }
 0x79f   : > { %v992_v45 = vadd.f32 %v1288_v7, %v991_v44  ;;  %v1454_v46 = vpop.f32.mrb[15].mxu0  ;;  %v995_v47 = vsel %vm655_vm1, %v989_v42, -inf }
 0x7a0   : > { %996 = vmax.xlane.f32.xlu0 %v995_v47 }
 0x7a1   : > { %v998_v48 = vsel %vm655_vm1, %v992_v45, -inf }
 0x7a2   : > { %999 = vmax.xlane.f32.xlu1 %v998_v48 }
 0x82d   : > { %v997_v49 = vpop.xlane.xlu0 %996 }
 0x82e   : > { %v1001_v50 = vsub.f32 %v989_v42, %v997_v49 }
 0x82f   : > { %v1000_v23 = vpop.xlane.xlu1 %999 }
 0x830   : > { %v1003_v51 = vmul.f32 1.442695, %v1001_v50  ;;  %v1002_v52 = vsub.f32 %v992_v45, %v1000_v23 }
 0x832   : > { %1583 = vpow2.f32 %v1003_v51  ;;  %v1005_v0 = vmul.f32 1.442695, %v1002_v52 }
 0x834   : > { %1585 = vpow2.f32 %v1005_v0 }
 0x83c   : > { %v1584_v53 = vpop.eup %1583 }
 0x83d   : > { %v1007_v54 = vsel %vm655_vm1, %v1584_v53, 0.0 }
 0x83e   : > { %v1586_v55 = vpop.eup %1585  ;;  %1008 = vadd.xlane.f32.xlu0 %v1007_v54 }
 0x83f   : > { %v1010_v56 = vsel %vm655_vm1, %v1586_v55, 0.0 }
 0x840   : > { %1011 = vadd.xlane.f32.xlu1 %v1010_v56 }
 0x8cb   : > { %v1009_v59 = vpop.xlane.xlu0 %1008 }
 0x8cc   : > { %1587 = vrcp.f32 %v1009_v59 }
 0x8cd   : > { %v1012_v60 = vpop.xlane.xlu1 %1011 }
 0x8ce   : > { %1589 = vrcp.f32 %v1012_v60 }
 0x8d6   : > { %v1588_v61 = vpop.eup %1587 }
 0x8d7   : > { %v1017_v63 = vmul.f32 %v1588_v61, %v1584_v53 }
 0x8d8   : > { %v1590_v62 = vpop.eup %1589 }
 0x8d9   : > { %v1018_v9 = vmul.f32 %v1590_v62, %v1586_v55 }
 0x8db   : > { %v1019_v10 = vpack.c.bf16 %v1018_v9, %v1017_v63 }
 0x8dd   : > { %1458 = vmatmul.mubr.msk.bf16.vlgmr.msra.gmra.mrb[16].mxu0 %vm655_vm1, %v1019_v10 }
 0x9b0   : > { %v1062_v11 = vpop.f32.mrb[16].mxu0 }
 0x9b1   : > { %1291 = vst [vmem:[%s2215_s6 + $0x20] sm:$0xff] %v1062_v11  ;;  %v1459_v12 = vpop.f32.mrb[17].mxu0 }
 0x9b2   : > { %v1065_v13 = vpop.f32.mrb[18].mxu0 }
 0x9b3   : > { %1292 = vst [vmem:[%s2215_s6 + $0x28] sm:$0xff] %v1065_v13  ;;  %v1460_v14 = vpop.f32.mrb[19].mxu0 }
 0x9b4   : > { %1722 = shalt.err (!%p1719_p0)
}
 0x9b5   : > { %s1723_s13 = scalar_lea.hbm %s2267_s1, 768  ;;  %s1727_s29 = scalar_lea.hbm %s2323_s5, 1536 }
 0x9b6   : > { %p1724_p2 = scmp.ne.s32.totalorder %s2267_s1, %s1723_s13  ;;  %p1728_p3 = scmp.lt.u32.totalorder %s2267_s1, %s2323_s5 }
 0x9b7   : > { %p1729_p11 = scmp.lt.u32.totalorder %s1727_s29, %s1723_s13  ;;  %p1731_p10 = scmp.lt.u32.totalorder %s1723_s13, %s2267_s1 }
 0x9b8   : > { %p1725_p9 = pnand %p1724_p2, %p2369_p13 }
 0x9b9   : > { %p1730_p5 = por %p1729_p11, %p1728_p3 }
 0x9ba   : > { %p1726_p1 = pneg %p1725_p9 }
 0x9bb   : > { %p1732_p7 = por %p1731_p10, %p1730_p5 }
 0x9bd   : > { %p1733_p4 = pnand %p1732_p7, %p1726_p1 }
 0x9bf   : > { %1736 = shalt.err (!%p1733_p4)
}
 0x9c0   : > { %s1810_s14 = smov 128   ;;  %s1811_s20 = smov 8  }
 0x9c1   : > { %1479 = dma.vmem_to_hbm [thread:$0]  (%p2369_p13), %s2262_s26, 768, %s2267_s1, %s1073_s11, %s1810_s14, %s1810_s14, %s1811_s20  }
 0x9c2 PF: > { %s2370_s17 = sld [smem:[#allocation20_spill]]  ;;  %s2371_s16 = sld [smem:[#allocation17_spill]] }
 0x9c3   : > { %s1104_s6 = sand.u32 1, %s1779_s18  }
 0x9c4   : > { %s1105_s27 = scalar_lea.sflag [#allocation5], %s1104_s6 }
 0x9c8   : > { %p2372_p6 = scmp.ne.s32.totalorder %s2370_s17, 0  ;;  %p2373_p8 = scmp.ge.s32.totalorder %s2371_s16, 2 }
 0x9ca   : > { %p1496_p12 = pnand %p2373_p8, %p2372_p6 }
 0x9cc   : > { %1774 = dma.done.wait (!%p1496_p12), %s1105_s27, 768  }
 0x9cd   : > { %1776 = vsyncadd (!%p1496_p12), %s1105_s27, 4294966528  ;;  %s25_s23 = sadd.s32 1, %s2371_s16   ;;  %s2374_s9 = sld [smem:[#allocation16_spill]] }
 0x9ce   : > { %p22_p0 = scmp.ge.s32.totalorder %s25_s23, 4   ;;  %s2375_s20 = sld [smem:[#allocation19_spill]] }
 0x9cf   : > { %s2376_s10 = sld [smem:[#allocation18_spill]]  ;;  %s2377_s18 = smov %s1783_s19 }
 0x9d0   : > { %s2379_s21 = smov %s1795_s22  ;;  %24 = sbr.rel (!%p22_p0) target bundleno = 11 (0xb), region = 128 }
 0x9d3   : > { %s2378_s19 = smov %s2374_s9 }
 0x9d5   : > { %s2380_s22 = smov %s2376_s10 }
 0x9d7   :  { %1110 = vsyncpa [#allocation4], 1 }
 0x9d8   :  { %1112 = vsyncpa [#allocation4 + $0x1], 1 }
 0x9d9   :  { %1113 = vsyncpa [#allocation7], 1 }
 0x9da   :  { %1115 = vsyncpa [#allocation7 + $0x1], 1 }
 0x9db   :  { %1116 = vsyncpa [#allocation10], 1 }
 0x9dc   :  { %1117 = vsyncpa [#allocation5], 1 }
 0x9dd   :  { %1119 = vsyncpa [#allocation5 + $0x1], 1 }

</bundles_post_ra>
